<compile_context>
chip_gen: v6e
topology: v6e:2x2x1
jax: 0.10.0
libtpu: 0.0.40
codegen_flags: <defaults>
</compile_context>

<pallas_src>
import functools

import jax
import jax.numpy as jnp
from jax.experimental import pallas as pl
from jax.experimental.pallas import tpu as pltpu


def _round_up(x, m):
    return (x + m - 1) // m * m


def _fused_mlp_kernel(num_layers, x_ref, w_ref, b_ref, o_ref, h0_ref, h1_ref):
    """One batch tile through the whole folded Linear+ReLU stack.

    x_ref : (TM, D)     f32  input activations (zero-padded lanes)
    w_ref : (L, D, D)   bf16 folded weights, (in, out) layout, zero-padded
    b_ref : (L, 1, D)   f32  folded biases, zero-padded
    o_ref : (TM, D)     f32  output activations
    h0/h1 : (TM, D)     f32  VMEM ping-pong activation scratch
    """
    bufs = (h0_ref, h1_ref)
    src = x_ref
    for layer in range(num_layers):  # static unroll; layer count is small
        dst = o_ref if layer == num_layers - 1 else bufs[layer % 2]
        # bf16 MXU matmul, f32 accumulate.
        acc = jnp.dot(
            src[...].astype(jnp.bfloat16),
            w_ref[layer],
            preferred_element_type=jnp.float32,
        )
        # f32 bias + ReLU epilogue; zero-padded lanes stay exactly 0.
        dst[...] = jnp.maximum(acc + b_ref[layer], 0.0)
        src = dst


def dae_forward(x, layer_params, *, eps=1e-5):
    """Fused eval-mode forward of the DAE reconstruction path.

    layer_params: list of dicts, each with
      W (out, in), b (out,), gamma (out,), beta (out,), mean (out,), var (out,)
    """
    batch, in_features = x.shape

    # ---- fold BatchNorm into each Linear, transpose weights to (in, out) ----
    folded = []
    dims = [in_features]
    for p in layer_params:
        scale = p["gamma"] / jnp.sqrt(p["var"] + eps)
        w_f = (p["W"] * scale[:, None]).T                     # (in, out)
        b_f = (p["b"] - p["mean"]) * scale + p["beta"]        # (out,)
        folded.append((w_f.astype(jnp.float32), b_f.astype(jnp.float32)))
        dims.append(p["W"].shape[0])

    num_layers = len(folded)
    out_features = dims[-1]
    d_pad = _round_up(max(dims), 128)                         # lane-dense width

    # ---- pack padded, VMEM-resident weight / bias stacks ----
    w_stack = jnp.zeros((num_layers, d_pad, d_pad), jnp.bfloat16)
    b_stack = jnp.zeros((num_layers, 1, d_pad), jnp.float32)
    for l, (w_f, b_f) in enumerate(folded):
        din, dout = w_f.shape
        w_stack = w_stack.at[l, :din, :dout].set(w_f.astype(jnp.bfloat16))
        b_stack = b_stack.at[l, 0, :dout].set(b_f)

    # ---- batch tiling: one M block for small batches, 256-row tiles otherwise
    if batch <= 512:
        tm = _round_up(batch, 8)
        m_pad = tm
    else:
        tm = 256
        m_pad = _round_up(batch, tm)

    x_pad = jnp.zeros((m_pad, d_pad), jnp.float32)
    x_pad = x_pad.at[:batch, :in_features].set(x.astype(jnp.float32))

    kernel = functools.partial(_fused_mlp_kernel, num_layers)

    out_pad = pl.pallas_call(
        kernel,
        out_shape=jax.ShapeDtypeStruct((m_pad, d_pad), jnp.float32),
        grid_spec=pltpu.PrefetchScalarGridSpec(
            num_scalar_prefetch=0,
            grid=(m_pad // tm,),
            in_specs=[
                pl.BlockSpec((tm, d_pad), lambda i: (i, 0)),
                pl.BlockSpec((num_layers, d_pad, d_pad), lambda i: (0, 0, 0)),
                pl.BlockSpec((num_layers, 1, d_pad), lambda i: (0, 0, 0)),
            ],
            out_specs=pl.BlockSpec((tm, d_pad), lambda i: (i, 0)),
            scratch_shapes=[
                pltpu.VMEM((tm, d_pad), jnp.float32),
                pltpu.VMEM((tm, d_pad), jnp.float32),
            ],
        ),
        compiler_params=pltpu.CompilerParams(
            dimension_semantics=("parallel",),
            # Tiny footprint here; stays well under v7x's 64 MiB VMEM.
            vmem_limit_bytes=48 * 1024 * 1024,
        ),
    )(x_pad, w_stack, b_stack)

    return out_pad[:batch, :out_features]


def _ref_forward(x, layer_params, *, eps=1e-5):
    """Pure-JAX reference with identical numerics (bf16 matmul, f32 epilogue)."""
    h = x.astype(jnp.float32)
    for p in layer_params:
        scale = p["gamma"] / jnp.sqrt(p["var"] + eps)
        w_f = (p["W"] * scale[:, None]).T
        b_f = (p["b"] - p["mean"]) * scale + p["beta"]
        h = jnp.dot(
            h.astype(jnp.bfloat16),
            w_f.astype(jnp.bfloat16),
            preferred_element_type=jnp.float32,
        ) + b_f
        h = jnp.maximum(h, 0.0)
    return h


def _make_layer_params(key, in_dim, out_dim):
    ks = jax.random.split(key, 6)
    return {
        "W": 0.1 * jax.random.normal(ks[0], (out_dim, in_dim), jnp.float32),
        "b": 0.1 * jax.random.normal(ks[1], (out_dim,), jnp.float32),
        "gamma": jax.random.uniform(ks[2], (out_dim,), jnp.float32, 0.8, 1.2),
        "beta": 0.1 * jax.random.normal(ks[3], (out_dim,), jnp.float32),
        "mean": 0.1 * jax.random.normal(ks[4], (out_dim,), jnp.float32),
        "var": jax.random.uniform(ks[5], (out_dim,), jnp.float32, 0.5, 1.5),
    }


if __name__ == "__main__":
    key = jax.random.PRNGKey(0)

    # Small DAEClassifier config:
    #   len_cat=10, len_num=14  -> input features 24
    #   encoder_hidden_list=[64, 48], bottleneck=16, decoder_hidden_list=[48, 64]
    len_cat, len_num = 10, 14
    in_features = len_cat + len_num
    encoder_hidden_list = [64, 48]
    bottleneck_size = 16
    decoder_hidden_list = [48, 64]
    batch = 16

    # forward() path layer dims (Linear->BN->ReLU->Dropout each):
    layer_dims = []
    layer_dims.append((in_features, encoder_hidden_list[0]))        # encoder_calibrate
    for prev, cur in zip(encoder_hidden_list[:-1], encoder_hidden_list[1:]):
        layer_dims.append((prev, cur))                              # encoder_list
    layer_dims.append((encoder_hidden_list[-1], bottleneck_size))   # bottleneck
    layer_dims.append((bottleneck_size, decoder_hidden_list[0]))    # decoder_calibrate
    for prev, cur in zip(decoder_hidden_list[:-1], decoder_hidden_list[1:]):
        layer_dims.append((prev, cur))                              # decoder_list
    layer_dims.append((decoder_hidden_list[-1], in_features))       # reconstruct

    key, xk = jax.random.split(key)
    x = jax.random.normal(xk, (batch, in_features), jnp.float32)

    layer_params = []
    for (din, dout) in layer_dims:
        key, lk = jax.random.split(key)
        layer_params.append(_make_layer_params(lk, din, dout))

    out = dae_forward(x, layer_params)
    out = jax.block_until_ready(out)

    ref = jax.block_until_ready(_ref_forward(x, layer_params))

    assert out.shape == (batch, in_features), out.shape
    assert jnp.allclose(out, ref, rtol=2e-3, atol=2e-3), (
        float(jnp.max(jnp.abs(out - ref)))
    )

    print("KERNEL_OK")
</pallas_src>

<mosaic_0001>
module attributes {stable_mosaic.version = 11 : i64} {
  func.func @_fused_mlp_kernel(%arg0: i32, %arg1: memref<16x128xf32, #tpu.memory_space<vmem>>, %arg2: memref<6x128x128xbf16, #tpu.memory_space<vmem>>, %arg3: memref<6x1x128xf32, #tpu.memory_space<vmem>>, %arg4: memref<16x128xf32, #tpu.memory_space<vmem>>, %arg5: memref<16x128xf32, #tpu.memory_space<vmem>>, %arg6: memref<16x128xf32, #tpu.memory_space<vmem>>) attributes {dimension_semantics = [#tpu.dimension_semantics<parallel>], iteration_bounds = array<i64: 1>, scalar_prefetch = 0 : i64, scratch_operands = 2 : i64, tpu.core_type = #tpu.core_type<tc>, window_params = [{transform_indices = @transform_0, window_bounds = array<i64: 16, 128>}, {pipeline_mode = #tpu.pipeline_mode<synchronous>, transform_indices = @transform_1, window_bounds = array<i64: 6, 128, 128>}, {pipeline_mode = #tpu.pipeline_mode<synchronous>, transform_indices = @transform_2, window_bounds = array<i64: 6, 1, 128>}, {transform_indices = @transform_3, window_bounds = array<i64: 16, 128>}]} {
    %c0 = arith.constant 0 : index
    %c0_0 = arith.constant 0 : index
    %0 = vector.load %arg1[%c0, %c0_0] : memref<16x128xf32, #tpu.memory_space<vmem>>, vector<16x128xf32>
    %1 = arith.truncf %0 : vector<16x128xf32> to vector<16x128xbf16>
    %c0_1 = arith.constant 0 : index
    %c0_2 = arith.constant 0 : index
    %c0_3 = arith.constant 0 : index
    %2 = vector.load %arg2[%c0_1, %c0_2, %c0_3] : memref<6x128x128xbf16, #tpu.memory_space<vmem>>, vector<1x128x128xbf16>
    %3 = vector.shape_cast %2 : vector<1x128x128xbf16> to vector<128x128xbf16>
    %cst = arith.constant dense<0.000000e+00> : vector<16x128xf32>
    %4 = tpu.matmul %1, %3, %cst {dimension_numbers = #tpu.dot_dimension_numbers<[1], [0], [0], [1], [0, 0, 1, 1], [], []>} : vector<16x128xbf16>, vector<128x128xbf16>, vector<16x128xf32> -> vector<16x128xf32>
    %c0_4 = arith.constant 0 : index
    %c0_5 = arith.constant 0 : index
    %c0_6 = arith.constant 0 : index
    %5 = vector.load %arg3[%c0_4, %c0_5, %c0_6] : memref<6x1x128xf32, #tpu.memory_space<vmem>>, vector<1x1x128xf32>
    %6 = vector.shape_cast %5 : vector<1x1x128xf32> to vector<1x128xf32>
    %7 = vector.broadcast %6 : vector<1x128xf32> to vector<16x128xf32>
    %8 = arith.addf %4, %7 : vector<16x128xf32>
    %cst_7 = arith.constant 0.000000e+00 : f32
    %9 = vector.broadcast %cst_7 : f32 to vector<16x128xf32>
    %10 = arith.maximumf %8, %9 : vector<16x128xf32>
    %c0_8 = arith.constant 0 : index
    %c0_9 = arith.constant 0 : index
    %11 = vector.load %arg5[%c0_8, %c0_9] : memref<16x128xf32, #tpu.memory_space<vmem>>, vector<16x128xf32>
    tpu.vector_store %arg5[%c0_8, %c0_9], %10 {strides = array<i32>} : memref<16x128xf32, #tpu.memory_space<vmem>>, vector<16x128xf32>,
    %c0_10 = arith.constant 0 : index
    %c0_11 = arith.constant 0 : index
    %12 = vector.load %arg5[%c0_10, %c0_11] : memref<16x128xf32, #tpu.memory_space<vmem>>, vector<16x128xf32>
    %13 = arith.truncf %12 : vector<16x128xf32> to vector<16x128xbf16>
    %c1 = arith.constant 1 : index
    %c0_12 = arith.constant 0 : index
    %c0_13 = arith.constant 0 : index
    %14 = vector.load %arg2[%c1, %c0_12, %c0_13] : memref<6x128x128xbf16, #tpu.memory_space<vmem>>, vector<1x128x128xbf16>
    %15 = vector.shape_cast %14 : vector<1x128x128xbf16> to vector<128x128xbf16>
    %cst_14 = arith.constant dense<0.000000e+00> : vector<16x128xf32>
    %16 = tpu.matmul %13, %15, %cst_14 {dimension_numbers = #tpu.dot_dimension_numbers<[1], [0], [0], [1], [0, 0, 1, 1], [], []>} : vector<16x128xbf16>, vector<128x128xbf16>, vector<16x128xf32> -> vector<16x128xf32>
    %c1_15 = arith.constant 1 : index
    %c0_16 = arith.constant 0 : index
    %c0_17 = arith.constant 0 : index
    %17 = vector.load %arg3[%c1_15, %c0_16, %c0_17] : memref<6x1x128xf32, #tpu.memory_space<vmem>>, vector<1x1x128xf32>
    %18 = vector.shape_cast %17 : vector<1x1x128xf32> to vector<1x128xf32>
    %19 = vector.broadcast %18 : vector<1x128xf32> to vector<16x128xf32>
    %20 = arith.addf %16, %19 : vector<16x128xf32>
    %cst_18 = arith.constant 0.000000e+00 : f32
    %21 = vector.broadcast %cst_18 : f32 to vector<16x128xf32>
    %22 = arith.maximumf %20, %21 : vector<16x128xf32>
    %c0_19 = arith.constant 0 : index
    %c0_20 = arith.constant 0 : index
    %23 = vector.load %arg6[%c0_19, %c0_20] : memref<16x128xf32, #tpu.memory_space<vmem>>, vector<16x128xf32>
    tpu.vector_store %arg6[%c0_19, %c0_20], %22 {strides = array<i32>} : memref<16x128xf32, #tpu.memory_space<vmem>>, vector<16x128xf32>,
    %c0_21 = arith.constant 0 : index
    %c0_22 = arith.constant 0 : index
    %24 = vector.load %arg6[%c0_21, %c0_22] : memref<16x128xf32, #tpu.memory_space<vmem>>, vector<16x128xf32>
    %25 = arith.truncf %24 : vector<16x128xf32> to vector<16x128xbf16>
    %c2 = arith.constant 2 : index
    %c0_23 = arith.constant 0 : index
    %c0_24 = arith.constant 0 : index
    %26 = vector.load %arg2[%c2, %c0_23, %c0_24] : memref<6x128x128xbf16, #tpu.memory_space<vmem>>, vector<1x128x128xbf16>
    %27 = vector.shape_cast %26 : vector<1x128x128xbf16> to vector<128x128xbf16>
    %cst_25 = arith.constant dense<0.000000e+00> : vector<16x128xf32>
    %28 = tpu.matmul %25, %27, %cst_25 {dimension_numbers = #tpu.dot_dimension_numbers<[1], [0], [0], [1], [0, 0, 1, 1], [], []>} : vector<16x128xbf16>, vector<128x128xbf16>, vector<16x128xf32> -> vector<16x128xf32>
    %c2_26 = arith.constant 2 : index
    %c0_27 = arith.constant 0 : index
    %c0_28 = arith.constant 0 : index
    %29 = vector.load %arg3[%c2_26, %c0_27, %c0_28] : memref<6x1x128xf32, #tpu.memory_space<vmem>>, vector<1x1x128xf32>
    %30 = vector.shape_cast %29 : vector<1x1x128xf32> to vector<1x128xf32>
    %31 = vector.broadcast %30 : vector<1x128xf32> to vector<16x128xf32>
    %32 = arith.addf %28, %31 : vector<16x128xf32>
    %cst_29 = arith.constant 0.000000e+00 : f32
    %33 = vector.broadcast %cst_29 : f32 to vector<16x128xf32>
    %34 = arith.maximumf %32, %33 : vector<16x128xf32>
    %c0_30 = arith.constant 0 : index
    %c0_31 = arith.constant 0 : index
    %35 = vector.load %arg5[%c0_30, %c0_31] : memref<16x128xf32, #tpu.memory_space<vmem>>, vector<16x128xf32>
    tpu.vector_store %arg5[%c0_30, %c0_31], %34 {strides = array<i32>} : memref<16x128xf32, #tpu.memory_space<vmem>>, vector<16x128xf32>,
    %c0_32 = arith.constant 0 : index
    %c0_33 = arith.constant 0 : index
    %36 = vector.load %arg5[%c0_32, %c0_33] : memref<16x128xf32, #tpu.memory_space<vmem>>, vector<16x128xf32>
    %37 = arith.truncf %36 : vector<16x128xf32> to vector<16x128xbf16>
    %c3 = arith.constant 3 : index
    %c0_34 = arith.constant 0 : index
    %c0_35 = arith.constant 0 : index
    %38 = vector.load %arg2[%c3, %c0_34, %c0_35] : memref<6x128x128xbf16, #tpu.memory_space<vmem>>, vector<1x128x128xbf16>
    %39 = vector.shape_cast %38 : vector<1x128x128xbf16> to vector<128x128xbf16>
    %cst_36 = arith.constant dense<0.000000e+00> : vector<16x128xf32>
    %40 = tpu.matmul %37, %39, %cst_36 {dimension_numbers = #tpu.dot_dimension_numbers<[1], [0], [0], [1], [0, 0, 1, 1], [], []>} : vector<16x128xbf16>, vector<128x128xbf16>, vector<16x128xf32> -> vector<16x128xf32>
    %c3_37 = arith.constant 3 : index
    %c0_38 = arith.constant 0 : index
    %c0_39 = arith.constant 0 : index
    %41 = vector.load %arg3[%c3_37, %c0_38, %c0_39] : memref<6x1x128xf32, #tpu.memory_space<vmem>>, vector<1x1x128xf32>
    %42 = vector.shape_cast %41 : vector<1x1x128xf32> to vector<1x128xf32>
    %43 = vector.broadcast %42 : vector<1x128xf32> to vector<16x128xf32>
    %44 = arith.addf %40, %43 : vector<16x128xf32>
    %cst_40 = arith.constant 0.000000e+00 : f32
    %45 = vector.broadcast %cst_40 : f32 to vector<16x128xf32>
    %46 = arith.maximumf %44, %45 : vector<16x128xf32>
    %c0_41 = arith.constant 0 : index
    %c0_42 = arith.constant 0 : index
    %47 = vector.load %arg6[%c0_41, %c0_42] : memref<16x128xf32, #tpu.memory_space<vmem>>, vector<16x128xf32>
    tpu.vector_store %arg6[%c0_41, %c0_42], %46 {strides = array<i32>} : memref<16x128xf32, #tpu.memory_space<vmem>>, vector<16x128xf32>,
    %c0_43 = arith.constant 0 : index
    %c0_44 = arith.constant 0 : index
    %48 = vector.load %arg6[%c0_43, %c0_44] : memref<16x128xf32, #tpu.memory_space<vmem>>, vector<16x128xf32>
    %49 = arith.truncf %48 : vector<16x128xf32> to vector<16x128xbf16>
    %c4 = arith.constant 4 : index
    %c0_45 = arith.constant 0 : index
    %c0_46 = arith.constant 0 : index
    %50 = vector.load %arg2[%c4, %c0_45, %c0_46] : memref<6x128x128xbf16, #tpu.memory_space<vmem>>, vector<1x128x128xbf16>
    %51 = vector.shape_cast %50 : vector<1x128x128xbf16> to vector<128x128xbf16>
    %cst_47 = arith.constant dense<0.000000e+00> : vector<16x128xf32>
    %52 = tpu.matmul %49, %51, %cst_47 {dimension_numbers = #tpu.dot_dimension_numbers<[1], [0], [0], [1], [0, 0, 1, 1], [], []>} : vector<16x128xbf16>, vector<128x128xbf16>, vector<16x128xf32> -> vector<16x128xf32>
    %c4_48 = arith.constant 4 : index
    %c0_49 = arith.constant 0 : index
    %c0_50 = arith.constant 0 : index
    %53 = vector.load %arg3[%c4_48, %c0_49, %c0_50] : memref<6x1x128xf32, #tpu.memory_space<vmem>>, vector<1x1x128xf32>
    %54 = vector.shape_cast %53 : vector<1x1x128xf32> to vector<1x128xf32>
    %55 = vector.broadcast %54 : vector<1x128xf32> to vector<16x128xf32>
    %56 = arith.addf %52, %55 : vector<16x128xf32>
    %cst_51 = arith.constant 0.000000e+00 : f32
    %57 = vector.broadcast %cst_51 : f32 to vector<16x128xf32>
    %58 = arith.maximumf %56, %57 : vector<16x128xf32>
    %c0_52 = arith.constant 0 : index
    %c0_53 = arith.constant 0 : index
    %59 = vector.load %arg5[%c0_52, %c0_53] : memref<16x128xf32, #tpu.memory_space<vmem>>, vector<16x128xf32>
    tpu.vector_store %arg5[%c0_52, %c0_53], %58 {strides = array<i32>} : memref<16x128xf32, #tpu.memory_space<vmem>>, vector<16x128xf32>,
    %c0_54 = arith.constant 0 : index
    %c0_55 = arith.constant 0 : index
    %60 = vector.load %arg5[%c0_54, %c0_55] : memref<16x128xf32, #tpu.memory_space<vmem>>, vector<16x128xf32>
    %61 = arith.truncf %60 : vector<16x128xf32> to vector<16x128xbf16>
    %c5 = arith.constant 5 : index
    %c0_56 = arith.constant 0 : index
    %c0_57 = arith.constant 0 : index
    %62 = vector.load %arg2[%c5, %c0_56, %c0_57] : memref<6x128x128xbf16, #tpu.memory_space<vmem>>, vector<1x128x128xbf16>
    %63 = vector.shape_cast %62 : vector<1x128x128xbf16> to vector<128x128xbf16>
    %cst_58 = arith.constant dense<0.000000e+00> : vector<16x128xf32>
    %64 = tpu.matmul %61, %63, %cst_58 {dimension_numbers = #tpu.dot_dimension_numbers<[1], [0], [0], [1], [0, 0, 1, 1], [], []>} : vector<16x128xbf16>, vector<128x128xbf16>, vector<16x128xf32> -> vector<16x128xf32>
    %c5_59 = arith.constant 5 : index
    %c0_60 = arith.constant 0 : index
    %c0_61 = arith.constant 0 : index
    %65 = vector.load %arg3[%c5_59, %c0_60, %c0_61] : memref<6x1x128xf32, #tpu.memory_space<vmem>>, vector<1x1x128xf32>
    %66 = vector.shape_cast %65 : vector<1x1x128xf32> to vector<1x128xf32>
    %67 = vector.broadcast %66 : vector<1x128xf32> to vector<16x128xf32>
    %68 = arith.addf %64, %67 : vector<16x128xf32>
    %cst_62 = arith.constant 0.000000e+00 : f32
    %69 = vector.broadcast %cst_62 : f32 to vector<16x128xf32>
    %70 = arith.maximumf %68, %69 : vector<16x128xf32>
    %c0_63 = arith.constant 0 : index
    %c0_64 = arith.constant 0 : index
    %71 = vector.load %arg4[%c0_63, %c0_64] : memref<16x128xf32, #tpu.memory_space<vmem>>, vector<16x128xf32>
    tpu.vector_store %arg4[%c0_63, %c0_64], %70 {strides = array<i32>} : memref<16x128xf32, #tpu.memory_space<vmem>>, vector<16x128xf32>,
    return
  }
  func.func @transform_0(%arg0: i32) -> (i32, i32) {
    %c0_i32 = arith.constant 0 : i32
    %c0_i32_0 = arith.constant 0 : i32
    return %arg0, %c0_i32 : i32, i32
  }
  func.func @transform_1(%arg0: i32) -> (i32, i32, i32) {
    %c0_i32 = arith.constant 0 : i32
    %c0_i32_0 = arith.constant 0 : i32
    %c0_i32_1 = arith.constant 0 : i32
    %c0_i32_2 = arith.constant 0 : i32
    return %c0_i32, %c0_i32_0, %c0_i32_1 : i32, i32, i32
  }
  func.func @transform_2(%arg0: i32) -> (i32, i32, i32) {
    %c0_i32 = arith.constant 0 : i32
    %c0_i32_0 = arith.constant 0 : i32
    %c0_i32_1 = arith.constant 0 : i32
    %c0_i32_2 = arith.constant 0 : i32
    return %c0_i32, %c0_i32_0, %c0_i32_1 : i32, i32, i32
  }
  func.func @transform_3(%arg0: i32) -> (i32, i32) {
    %c0_i32 = arith.constant 0 : i32
    %c0_i32_0 = arith.constant 0 : i32
    return %arg0, %c0_i32 : i32, i32
  }
}

</mosaic_0001>

<bundles_post_ra>
// kernel: tpu_custom_call.1
= control target key start
LH: loop header
LB: loop body
LE: loop exit
PB: predicated region body
PF: predicated region fallthrough
CT: control target
= control target key end

     0   :  { %8 = vsyncpa [#allocation5], 0  ;;  %s1283_s0 = inlined_call_operand.hbm [shape: f32[16,128], index: 0, kind: input, shape index: {}]   ;;  %s1284_s1 = inlined_call_operand.hbm [shape: bf16[6,128,128], index: 1, kind: input, shape index: {}]   ;;  %s1285_s2 = inlined_call_operand.hbm [shape: f32[6,1,128], index: 2, kind: input, shape index: {}]   ;;  %s1286_s3 = inlined_call_operand.hbm [shape: f32[16,128], index: 3, kind: output, shape index: {}]  }
   0x1   :  { %9 = vsyncpa [#allocation8], 0 }
   0x2   :  { %10 = vsyncpa [#allocation6], 0  ;;  %s1173_s12 = smov [#allocation7]  }
   0x3   :  { %s28_s13 = sshll.u32 %s1173_s12, 4  ;;  %s29_s13 = int_to_ptr.vmem [resolvable:$true] %s28_s13 }
   0x4   :  { %s1095_s14 = scalar_lea.vmem %s29_s13, 6144  ;;  %p1100_p1 = scmp.lt.s32.totalorder %s29_s13, %s29_s13 }
   0x5   :  { %p1096_p0 = scmp.ne.s32.totalorder %s29_s13, %s1095_s14  ;;  %p1101_p2 = scmp.lt.s32.totalorder %s1095_s14, %s1095_s14 }
   0x7   :  { %p1102_p3 = por %p1101_p2, %p1100_p1 }
   0x9   :  { %p1103_p4 = pnand %p1102_p3, %p1096_p0 }
   0xb   :  { %1106 = shalt.err (!%p1103_p4)
}
   0xc   :  { %s1174_s15 = smov 64   ;;  %s1175_s16 = smov 4  }
   0xd   :  { %34 = dma.hbm_to_vmem [thread:$0]  %s1284_s1, 6144, %s29_s13, [#allocation8], %s1174_s15, %s1174_s15, %s1175_s16  }
   0xe   :  { %s1176_s19 = smov [#allocation4]  }
   0xf   :  { %s16_s20 = sshll.u32 %s1176_s19, 4  ;;  %s17_s20 = int_to_ptr.vmem [resolvable:$true] %s16_s20 }
  0x10   :  { %s1115_s21 = scalar_lea.vmem %s17_s20, 256  ;;  %p1120_p6 = scmp.lt.s32.totalorder %s17_s20, %s17_s20 }
  0x11   :  { %p1116_p5 = scmp.ne.s32.totalorder %s17_s20, %s1115_s21  ;;  %p1121_p7 = scmp.lt.s32.totalorder %s1115_s21, %s1115_s21 }
  0x13   :  { %p1122_p8 = por %p1121_p7, %p1120_p6 }
  0x15   :  { %p1123_p9 = pnand %p1122_p8, %p1116_p5 }
  0x17   :  { %1126 = shalt.err (!%p1123_p9)
}
  0x18   :  { %s1177_s22 = smov 128   ;;  %s1178_s23 = smov 8  }
  0x19   :  { %22 = dma.hbm_to_vmem [thread:$0]  %s1283_s0, 256, %s17_s20, [#allocation5], %s1177_s22, %s1177_s22, %s1178_s23  }
  0x1a   :  { %s1179_s1 = smov [#allocation9]  }
  0x1b   :  { %s40_s26 = sshll.u32 %s1179_s1, 4  ;;  %s41_s26 = int_to_ptr.vmem [resolvable:$true] %s40_s26 }
  0x1c   :  { %s1135_s27 = scalar_lea.vmem %s41_s26, 96  ;;  %p1140_p11 = scmp.lt.s32.totalorder %s41_s26, %s41_s26 }
  0x1d   :  { %p1136_p10 = scmp.ne.s32.totalorder %s41_s26, %s1135_s27  ;;  %p1141_p12 = scmp.lt.s32.totalorder %s1135_s27, %s1135_s27 }
  0x1f   :  { %p1142_p13 = por %p1141_p12, %p1140_p11 }
  0x21   :  { %p1143_p0 = pnand %p1142_p13, %p1136_p10 }
  0x23   :  { %1146 = shalt.err (!%p1143_p0)
}
  0x24   :  { %s1180_s28 = smov 16   ;;  %s1181_s29 = smov 1  }
  0x25   :  { %46 = dma.hbm_to_vmem [thread:$0]  %s1285_s2, 96, %s41_s26, [#allocation8], %s1180_s28, %s1180_s28, %s1181_s29  }
  0x26   :  { %1167 = dma.done.wait [#allocation5], 256  }
  0x27   :  { %1168 = vsyncadd [#allocation5], 4294967040 }
  0x28   :  { %1169 = dma.done.wait [#allocation8], 6240  }
  0x29   :  { %1170 = vsyncadd [#allocation8], 4294961056  ;;  %v1182_v0 = vmov 0.0   ;;  %vm1183_vm0 = vmmov 0   ;;  %v1039_v1 = vld [vmem:[#allocation7 + $0x38] sm:$0xff]   ;;  %v1040_v2 = vld [vmem:[#allocation7 + $0x30] sm:$0xff]  }
  0x2a   :  { %907 = vmatprep.subr.bf16.mxu0 %v1182_v0  ;;  %923 = vmatprep.mubr.msk.bf16.mxu0 %vm1183_vm0, %v1182_v0  ;;  %v1041_v3 = vld [vmem:[#allocation7 + $0x28] sm:$0xff]   ;;  %v1047_v4 = vld [vmem:[#allocation7 + $0x78] sm:$0xff]   ;;  %v1042_v5 = vld [vmem:[#allocation7 + $0x20] sm:$0xff]   ;;  %s1184_s0 = smov [#allocation10]  }
  0x2b   :  { %927 = vmatprep.subr.bf16.mxu1 %v1182_v0  ;;  %943 = vmatprep.mubr.msk.bf16.mxu1 %vm1183_vm0, %v1182_v0  ;;  %v1048_v6 = vld [vmem:[#allocation7 + $0x70] sm:$0xff]   ;;  %v1043_v7 = vld [vmem:[#allocation7 + $0x18] sm:$0xff]   ;;  %v1049_v8 = vld [vmem:[#allocation7 + $0x68] sm:$0xff]   ;;  %s786_s2 = sshll.u32 %s1184_s0, 4  ;;  %s787_s2 = int_to_ptr.vmem [resolvable:$true] %s786_s2 }
  0x2c   :  { %908 = vmatpush3.bf16.msra.mxu0 %v1039_v1  ;;  %928 = vmatpush3.bf16.msra.mxu1 %v1047_v4  ;;  %v1044_v9 = vld [vmem:[#allocation7 + $0x10] sm:$0xff]   ;;  %v1050_v10 = vld [vmem:[#allocation7 + $0x60] sm:$0xff]   ;;  %v1045_v11 = vld [vmem:[#allocation7 + $0x8] sm:$0xff]   ;;  %s1147_s5 = scalar_lea.vmem %s787_s2, 256  ;;  %p1152_p2 = scmp.lt.s32.totalorder %s787_s2, %s787_s2 }
  0x2d   :  { %909 = vmatprep.subr.bf16.mxu0 %v1182_v0  ;;  %929 = vmatprep.subr.bf16.mxu1 %v1182_v0  ;;  %v1051_v12 = vld [vmem:[#allocation7 + $0x58] sm:$0xff]   ;;  %v1046_v13 = vld [vmem:[#allocation7] sm:$0xff]   ;;  %v57_v14 = vld [vmem:[#allocation4] sm:$0xff]  ;;  %p1148_p1 = scmp.ne.s32.totalorder %s787_s2, %s1147_s5  ;;  %p1153_p3 = scmp.lt.s32.totalorder %s1147_s5, %s1147_s5 }
  0x2e   :  { %v58_v15 = vld [vmem:[#allocation4 + $0x8] sm:$0xff]  ;;  %v1052_v17 = vld [vmem:[#allocation7 + $0x50] sm:$0xff]   ;;  %v1053_v18 = vld [vmem:[#allocation7 + $0x48] sm:$0xff]  }
  0x2f   :  { %v59_v16 = vpack.c.bf16 %v58_v15, %v57_v14  ;;  %v1054_v19 = vld [vmem:[#allocation7 + $0x40] sm:$0xff]   ;;  %v1055_v20 = vld [vmem:[#allocation7 + $0xb8] sm:$0xff]   ;;  %v1056_v21 = vld [vmem:[#allocation7 + $0xb0] sm:$0xff]   ;;  %p1154_p4 = por %p1153_p3, %p1152_p2 }
  0x30   :  { %910 = vmatpush3.bf16.msra.mxu0 %v1040_v2  ;;  %930 = vmatpush3.bf16.msra.mxu1 %v1048_v6  ;;  %v1057_v22 = vld [vmem:[#allocation7 + $0xa8] sm:$0xff]   ;;  %v1058_v23 = vld [vmem:[#allocation7 + $0xa0] sm:$0xff]   ;;  %v1059_v24 = vld [vmem:[#allocation7 + $0x98] sm:$0xff]  }
  0x31   :  { %911 = vmatprep.subr.bf16.mxu0 %v1182_v0  ;;  %931 = vmatprep.subr.bf16.mxu1 %v1182_v0  ;;  %v799_v25 = vld [vmem:[#allocation9] ss:$0 sm:$0xff]  ;;  %v1060_v35 = vld [vmem:[#allocation7 + $0x90] sm:$0xff]   ;;  %v1061_v36 = vld [vmem:[#allocation7 + $0x88] sm:$0xff]   ;;  %p1155_p5 = pnand %p1154_p4, %p1148_p1 }
  0x32   :  { %v1062_v37 = vld [vmem:[#allocation7 + $0x80] sm:$0xff]   ;;  %v1063_v38 = vld [vmem:[#allocation7 + $0xf8] sm:$0xff]   ;;  %v1064_v39 = vld [vmem:[#allocation7 + $0xf0] sm:$0xff]  }
  0x33   :  { %v1065_v40 = vld [vmem:[#allocation7 + $0xe8] sm:$0xff]   ;;  %v1066_v41 = vld [vmem:[#allocation7 + $0xe0] sm:$0xff]   ;;  %v1067_v42 = vld [vmem:[#allocation7 + $0xd8] sm:$0xff]  }
  0x34   :  { %912 = vmatpush3.bf16.msra.mxu0 %v1041_v3  ;;  %932 = vmatpush3.bf16.msra.mxu1 %v1049_v8  ;;  %v808_v43 = vld [vmem:[#allocation9 + $0x1] ss:$0 sm:$0xff]  ;;  %v1068_v53 = vld [vmem:[#allocation7 + $0xd0] sm:$0xff]   ;;  %v1069_v54 = vld [vmem:[#allocation7 + $0xc8] sm:$0xff]  }
  0x35   :  { %913 = vmatprep.subr.bf16.mxu0 %v1182_v0  ;;  %933 = vmatprep.subr.bf16.mxu1 %v1182_v0  ;;  %v1070_v55 = vld [vmem:[#allocation7 + $0xc0] sm:$0xff]   ;;  %v1071_v56 = vld [vmem:[#allocation7 + $0x138] sm:$0xff]   ;;  %v1072_v57 = vld [vmem:[#allocation7 + $0x130] sm:$0xff]  }
  0x36   :  { %v1073_v58 = vld [vmem:[#allocation7 + $0x128] sm:$0xff]   ;;  %v1074_v59 = vld [vmem:[#allocation7 + $0x120] sm:$0xff]   ;;  %v1075_v60 = vld [vmem:[#allocation7 + $0x118] sm:$0xff]  }
  0x37   :  { %v817_v61 = vld [vmem:[#allocation9 + $0x2] ss:$0 sm:$0xff]  ;;  %v1076_v8 = vld [vmem:[#allocation7 + $0x110] sm:$0xff]   ;;  %v1083_v15 = vld [vmem:[#allocation7 + $0x158] sm:$0xff]  }
  0x38   :  { %914 = vmatpush3.bf16.msra.mxu0 %v1042_v5  ;;  %934 = vmatpush3.bf16.msra.mxu1 %v1050_v10  ;;  %v1078_v10 = vld [vmem:[#allocation7 + $0x100] sm:$0xff]  }
  0x39   :  { %915 = vmatprep.subr.bf16.mxu0 %v1182_v0  ;;  %935 = vmatprep.subr.bf16.mxu1 %v1182_v0  ;;  %v1082_v14 = vld [vmem:[#allocation7 + $0x160] sm:$0xff]  }
  0x3c   :  { %916 = vmatpush3.bf16.msra.mxu0 %v1043_v7  ;;  %936 = vmatpush3.bf16.msra.mxu1 %v1051_v12  ;;  %v1080_v12 = vld [vmem:[#allocation7 + $0x170] sm:$0xff]  }
  0x3d   :  { %917 = vmatprep.subr.bf16.mxu0 %v1182_v0  ;;  %937 = vmatprep.subr.bf16.mxu1 %v1182_v0 }
  0x40   :  { %918 = vmatpush3.bf16.msra.mxu0 %v1044_v9  ;;  %938 = vmatpush3.bf16.msra.mxu1 %v1052_v17  ;;  %v1077_v9 = vld [vmem:[#allocation7 + $0x108] sm:$0xff]  }
  0x41   :  { %919 = vmatprep.subr.bf16.mxu0 %v1182_v0  ;;  %939 = vmatprep.subr.bf16.mxu1 %v1182_v0 }
  0x44   :  { %920 = vmatpush3.bf16.msra.mxu0 %v1045_v11  ;;  %940 = vmatpush3.bf16.msra.mxu1 %v1053_v18  ;;  %v1079_v11 = vld [vmem:[#allocation7 + $0x178] sm:$0xff]  }
  0x45   :  { %921 = vmatprep.subr.bf16.mxu0 %v1182_v0  ;;  %941 = vmatprep.subr.bf16.mxu1 %v1182_v0 }
  0x48   :  { %922 = vmatpush3.bf16.msra.mxu0 %v1046_v13  ;;  %942 = vmatpush3.bf16.msra.mxu1 %v1054_v19  ;;  %v1081_v13 = vld [vmem:[#allocation7 + $0x168] sm:$0xff]  }
  0x49   :  { %947 = vmatprep.subr.bf16.mxu0 %v1182_v0  ;;  %967 = vmatprep.subr.bf16.mxu1 %v1182_v0 }
  0x4b   :  { %924 = vmatmul.mubr.bf16.vlgmr.msra.gmra.mxu0 %v59_v16  ;;  %v826_v16 = vld [vmem:[#allocation9 + $0x3] ss:$0 sm:$0xff] }
  0x4c   :  { %963 = vmatprep.mubr.msk.bf16.mxu0 %vm1183_vm0, %v1182_v0  ;;  %948 = vmatpush3.bf16.msra.mxu0 %v1055_v20 }
  0x4d   :  { %949 = vmatprep.subr.bf16.mxu0 %v1182_v0 }
  0x50   :  { %950 = vmatpush3.bf16.msra.mxu0 %v1056_v21 }
  0x51   :  { %951 = vmatprep.subr.bf16.mxu0 %v1182_v0 }
  0x54   :  { %952 = vmatpush3.bf16.msra.mxu0 %v1057_v22 }
  0x55   :  { %953 = vmatprep.subr.bf16.mxu0 %v1182_v0 }
  0x58   :  { %954 = vmatpush3.bf16.msra.mxu0 %v1058_v23 }
  0x59   :  { %955 = vmatprep.subr.bf16.mxu0 %v1182_v0 }
  0x5c   :  { %956 = vmatpush3.bf16.msra.mxu0 %v1059_v24 }
  0x5d   :  { %957 = vmatprep.subr.bf16.mxu0 %v1182_v0 }
  0x60   :  { %958 = vmatpush3.bf16.msra.mxu0 %v1060_v35 }
  0x61   :  { %959 = vmatprep.subr.bf16.mxu0 %v1182_v0 }
  0x64   :  { %960 = vmatpush3.bf16.msra.mxu0 %v1061_v36 }
  0x65   :  { %961 = vmatprep.subr.bf16.mxu0 %v1182_v0 }
  0x68   :  { %962 = vmatpush3.bf16.msra.mxu0 %v1062_v37 }
  0x69   :  { %987 = vmatprep.subr.bf16.mxu0 %v1182_v0 }
 0x10b   :  { %v165_v26 = vpop.f32.mrf.mxu0 }
 0x10c   :  { %v166_v28 = vadd.f32 %v799_v25, %v165_v26  ;;  %v1084_v26 = vld [vmem:[#allocation7 + $0x150] sm:$0xff]  }
 0x10d   :  { %v925_v27 = vpop.f32.mrf.mxu0 }
 0x10e   :  { %v172_v32 = vmax.f32 %v166_v28, 0.0  ;;  %v1085_v27 = vld [vmem:[#allocation7 + $0x148] sm:$0xff]   ;;  %v1086_v28 = vld [vmem:[#allocation7 + $0x140] sm:$0xff]  }
 0x10f   :  { %v168_v29 = vpop.f32.mrf.mxu0 }
 0x110   :  { %v169_v30 = vadd.f32 %v799_v25, %v168_v29  ;;  %v835_v29 = vld [vmem:[#allocation9 + $0x4] ss:$0 sm:$0xff] }
 0x111   :  { %v926_v31 = vpop.f32.mrf.mxu0 }
 0x112   :  { %v173_v33 = vmax.f32 %v169_v30, 0.0 }
 0x114   :  { %v178_v34 = vpack.c.bf16 %v173_v33, %v172_v32 }
 0x116   :  { %944 = vmatmul.mubr.bf16.vlgmr.msra.gmra.mxu1 %v178_v34 }
 0x117   :  { %983 = vmatprep.mubr.msk.bf16.mxu1 %vm1183_vm0, %v1182_v0  ;;  %968 = vmatpush3.bf16.msra.mxu1 %v1063_v38 }
 0x118   :  { %969 = vmatprep.subr.bf16.mxu1 %v1182_v0 }
 0x11b   :  { %970 = vmatpush3.bf16.msra.mxu1 %v1064_v39  ;;  %v844_v39 = vld [vmem:[#allocation9 + $0x5] ss:$0 sm:$0xff] }
 0x11c   :  { %971 = vmatprep.subr.bf16.mxu1 %v1182_v0 }
 0x11f   :  { %972 = vmatpush3.bf16.msra.mxu1 %v1065_v40 }
 0x120   :  { %973 = vmatprep.subr.bf16.mxu1 %v1182_v0 }
 0x123   :  { %974 = vmatpush3.bf16.msra.mxu1 %v1066_v41 }
 0x124   :  { %975 = vmatprep.subr.bf16.mxu1 %v1182_v0 }
 0x127   :  { %976 = vmatpush3.bf16.msra.mxu1 %v1067_v42 }
 0x128   :  { %977 = vmatprep.subr.bf16.mxu1 %v1182_v0 }
 0x12b   :  { %978 = vmatpush3.bf16.msra.mxu1 %v1068_v53 }
 0x12c   :  { %979 = vmatprep.subr.bf16.mxu1 %v1182_v0 }
 0x12f   :  { %980 = vmatpush3.bf16.msra.mxu1 %v1069_v54 }
 0x130   :  { %981 = vmatprep.subr.bf16.mxu1 %v1182_v0 }
 0x133   :  { %982 = vmatpush3.bf16.msra.mxu1 %v1070_v55 }
 0x134   :  { %1007 = vmatprep.subr.bf16.mxu1 %v1182_v0 }
 0x1d6   :  { %v286_v44 = vpop.f32.mrf.mxu1 }
 0x1d7   :  { %v287_v46 = vadd.f32 %v808_v43, %v286_v44 }
 0x1d8   :  { %v945_v45 = vpop.f32.mrf.mxu1 }
 0x1d9   :  { %v293_v50 = vmax.f32 %v287_v46, 0.0 }
 0x1da   :  { %v289_v47 = vpop.f32.mrf.mxu1 }
 0x1db   :  { %v290_v48 = vadd.f32 %v808_v43, %v289_v47 }
 0x1dc   :  { %v946_v49 = vpop.f32.mrf.mxu1 }
 0x1dd   :  { %v294_v51 = vmax.f32 %v290_v48, 0.0 }
 0x1df   :  { %v299_v52 = vpack.c.bf16 %v294_v51, %v293_v50 }
 0x1e1   :  { %964 = vmatmul.mubr.bf16.vlgmr.msra.gmra.mxu0 %v299_v52 }
 0x1e2   :  { %1003 = vmatprep.mubr.msk.bf16.mxu0 %vm1183_vm0, %v1182_v0  ;;  %988 = vmatpush3.bf16.msra.mxu0 %v1071_v56 }
 0x1e3   :  { %989 = vmatprep.subr.bf16.mxu0 %v1182_v0 }
 0x1e6   :  { %990 = vmatpush3.bf16.msra.mxu0 %v1072_v57 }
 0x1e7   :  { %991 = vmatprep.subr.bf16.mxu0 %v1182_v0 }
 0x1ea   :  { %992 = vmatpush3.bf16.msra.mxu0 %v1073_v58 }
 0x1eb   :  { %993 = vmatprep.subr.bf16.mxu0 %v1182_v0 }
 0x1ee   :  { %994 = vmatpush3.bf16.msra.mxu0 %v1074_v59 }
 0x1ef   :  { %995 = vmatprep.subr.bf16.mxu0 %v1182_v0 }
 0x1f2   :  { %996 = vmatpush3.bf16.msra.mxu0 %v1075_v60 }
 0x1f3   :  { %997 = vmatprep.subr.bf16.mxu0 %v1182_v0 }
 0x1f6   :  { %998 = vmatpush3.bf16.msra.mxu0 %v1076_v8 }
 0x1f7   :  { %999 = vmatprep.subr.bf16.mxu0 %v1182_v0 }
 0x1fa   :  { %1000 = vmatpush3.bf16.msra.mxu0 %v1077_v9 }
 0x1fb   :  { %1001 = vmatprep.subr.bf16.mxu0 %v1182_v0 }
 0x1fe   :  { %1002 = vmatpush3.bf16.msra.mxu0 %v1078_v10 }
 0x2a1   :  { %v407_v62 = vpop.f32.mrf.mxu0 }
 0x2a2   :  { %v408_v1 = vadd.f32 %v817_v61, %v407_v62 }
 0x2a3   :  { %v965_v63 = vpop.f32.mrf.mxu0 }
 0x2a4   :  { %v414_v5 = vmax.f32 %v408_v1, 0.0 }
 0x2a5   :  { %v410_v2 = vpop.f32.mrf.mxu0 }
 0x2a6   :  { %v411_v3 = vadd.f32 %v817_v61, %v410_v2 }
 0x2a7   :  { %v966_v4 = vpop.f32.mrf.mxu0 }
 0x2a8   :  { %v415_v6 = vmax.f32 %v411_v3, 0.0 }
 0x2aa   :  { %v420_v7 = vpack.c.bf16 %v415_v6, %v414_v5 }
 0x2ac   :  { %984 = vmatmul.mubr.bf16.vlgmr.msra.gmra.mxu1 %v420_v7 }
 0x2ad   :  { %1023 = vmatprep.mubr.msk.bf16.mxu1 %vm1183_vm0, %v1182_v0  ;;  %1008 = vmatpush3.bf16.msra.mxu1 %v1079_v11 }
 0x2ae   :  { %1009 = vmatprep.subr.bf16.mxu1 %v1182_v0 }
 0x2b1   :  { %1010 = vmatpush3.bf16.msra.mxu1 %v1080_v12 }
 0x2b2   :  { %1011 = vmatprep.subr.bf16.mxu1 %v1182_v0 }
 0x2b5   :  { %1012 = vmatpush3.bf16.msra.mxu1 %v1081_v13 }
 0x2b6   :  { %1013 = vmatprep.subr.bf16.mxu1 %v1182_v0 }
 0x2b9   :  { %1014 = vmatpush3.bf16.msra.mxu1 %v1082_v14 }
 0x2ba   :  { %1015 = vmatprep.subr.bf16.mxu1 %v1182_v0 }
 0x2bd   :  { %1016 = vmatpush3.bf16.msra.mxu1 %v1083_v15 }
 0x2be   :  { %1017 = vmatprep.subr.bf16.mxu1 %v1182_v0 }
 0x2c1   :  { %1018 = vmatpush3.bf16.msra.mxu1 %v1084_v26 }
 0x2c2   :  { %1019 = vmatprep.subr.bf16.mxu1 %v1182_v0 }
 0x2c5   :  { %1020 = vmatpush3.bf16.msra.mxu1 %v1085_v27 }
 0x2c6   :  { %1021 = vmatprep.subr.bf16.mxu1 %v1182_v0 }
 0x2c9   :  { %1022 = vmatpush3.bf16.msra.mxu1 %v1086_v28 }
 0x36c   :  { %v528_v17 = vpop.f32.mrf.mxu1 }
 0x36d   :  { %v529_v19 = vadd.f32 %v826_v16, %v528_v17 }
 0x36e   :  { %v985_v18 = vpop.f32.mrf.mxu1 }
 0x36f   :  { %v535_v23 = vmax.f32 %v529_v19, 0.0 }
 0x370   :  { %v531_v20 = vpop.f32.mrf.mxu1 }
 0x371   :  { %v532_v21 = vadd.f32 %v826_v16, %v531_v20 }
 0x372   :  { %v986_v22 = vpop.f32.mrf.mxu1 }
 0x373   :  { %v536_v24 = vmax.f32 %v532_v21, 0.0 }
 0x375   :  { %v541_v25 = vpack.c.bf16 %v536_v24, %v535_v23 }
 0x377   :  { %1004 = vmatmul.mubr.bf16.vlgmr.msra.gmra.mxu0 %v541_v25 }
 0x437   :  { %v649_v30 = vpop.f32.mrf.mxu0 }
 0x438   :  { %v650_v32 = vadd.f32 %v835_v29, %v649_v30 }
 0x439   :  { %v1005_v31 = vpop.f32.mrf.mxu0 }
 0x43a   :  { %v656_v36 = vmax.f32 %v650_v32, 0.0 }
 0x43b   :  { %v652_v33 = vpop.f32.mrf.mxu0 }
 0x43c   :  { %v653_v34 = vadd.f32 %v835_v29, %v652_v33 }
 0x43d   :  { %v1006_v35 = vpop.f32.mrf.mxu0 }
 0x43e   :  { %v657_v37 = vmax.f32 %v653_v34, 0.0 }
 0x440   :  { %v662_v38 = vpack.c.bf16 %v657_v37, %v656_v36 }
 0x442   :  { %1024 = vmatmul.mubr.bf16.vlgmr.msra.gmra.mxu1 %v662_v38 }
 0x502   :  { %v770_v40 = vpop.f32.mrf.mxu1 }
 0x503   :  { %v771_v41 = vadd.f32 %v844_v39, %v770_v40 }
 0x504   :  { %v1025_v42 = vpop.f32.mrf.mxu1 }
 0x505   :  { %v777_v43 = vmax.f32 %v771_v41, 0.0 }
 0x506   :  { %v773_v44 = vpop.f32.mrf.mxu1 }
 0x507   :  { %779 = vst [vmem:[#allocation10] sm:$0xff] %v777_v43  ;;  %v774_v0 = vadd.f32 %v844_v39, %v773_v44 }
 0x508   :  { %v1026_v45 = vpop.f32.mrf.mxu1 }
 0x509   :  { %v778_v46 = vmax.f32 %v774_v0, 0.0 }
 0x50b   :  { %780 = vst [vmem:[#allocation10 + $0x8] sm:$0xff] %v778_v46 }
 0x50c   :  { %1158 = shalt.err (!%p1155_p5)
}
 0x50d   :  { %792 = dma.vmem_to_hbm [thread:$0]  %s787_s2, 256, %s1286_s3, [#allocation6], %s1177_s22, %s1177_s22, %s1178_s23  }
 0x50e   :  { %1171 = dma.done.wait [#allocation6], 256  }
 0x50f   :  { %1172 = vsyncadd [#allocation6], 4294967040 }
 0x510   :  { %796 = vsyncpa [#allocation5], 1 }
 0x511   :  { %797 = vsyncpa [#allocation8], 1 }
 0x512   :  { %798 = vsyncpa [#allocation6], 1 }

</bundles_post_ra>
